<compile_context>
chip_gen: v5e
topology: v5e:2x2
jax: 0.10.0
libtpu: 0.0.40
codegen_flags: <defaults>
</compile_context>

<pallas_src>
import jax
import jax.numpy as jnp
from jax.experimental import pallas as pl
from jax.experimental.pallas import tpu as pltpu

_NEG_BIG = -1e30  # bias for padded action columns -> exp() underflows to 0


def _round_up(x, m):
    return ((x + m - 1) // m) * m


# --------------------------------------------------------------------------
# Kernel body: whole MLP hot path (3 matmuls + ReLUs + softmax) in one pass.
# --------------------------------------------------------------------------
def _actor_kernel(obs_ref, w1_ref, b1_ref, w2_ref, b2_ref, w3_ref, b3_ref,
                  out_ref):
    mm_dtype = w1_ref.dtype  # f32 or bf16 (f32 accumulation either way)

    x = obs_ref[...].astype(mm_dtype)

    h1 = jnp.dot(x, w1_ref[...], preferred_element_type=jnp.float32)
    h1 = jnp.maximum(h1 + b1_ref[...], 0.0)

    h2 = jnp.dot(h1.astype(mm_dtype), w2_ref[...],
                 preferred_element_type=jnp.float32)
    h2 = jnp.maximum(h2 + b2_ref[...], 0.0)

    logits = jnp.dot(h2.astype(mm_dtype), w3_ref[...],
                     preferred_element_type=jnp.float32) + b3_ref[...]

    # Numerically-stable softmax along the lane axis. Padded action columns
    # carry a -1e30 bias, so exp() is exactly 0 there and the denominator only
    # sees the real actions.
    m = jnp.max(logits, axis=-1, keepdims=True)
    e = jnp.exp(logits - m)
    denom = jnp.sum(e, axis=-1, keepdims=True)
    out_ref[...] = (e * pl.reciprocal(denom, approx=True)).astype(out_ref.dtype)


# --------------------------------------------------------------------------
# One-time parameter preparation (hoisted out of the per-call path).
# --------------------------------------------------------------------------
def prepare_actor_params(w1, b1, w2, b2, w3, b3, *, param_dtype=jnp.float32):
    """Pad hidden/action dims to multiples of 128 and cast weights once.

    Weights are stored as [in, out] (= PyTorch weight.T).  `param_dtype` may be
    jnp.bfloat16 on any of v5e/v6e/v7x (the MXU takes bf16 inputs with f32
    accumulation); biases stay f32.  Call this at init / after each optimizer
    step, NOT per forward call.
    """
    obs_dim, hidden_dim = w1.shape
    action_dim = w3.shape[1]
    H = _round_up(hidden_dim, 128)
    A = _round_up(action_dim, 128)
    f32 = jnp.float32

    w1_p = jnp.zeros((obs_dim, H), param_dtype).at[:, :hidden_dim].set(
        w1.astype(param_dtype))
    b1_p = jnp.zeros((1, H), f32).at[:, :hidden_dim].set(
        b1.reshape(1, -1).astype(f32))
    w2_p = jnp.zeros((H, H), param_dtype).at[:hidden_dim, :hidden_dim].set(
        w2.astype(param_dtype))
    b2_p = jnp.zeros((1, H), f32).at[:, :hidden_dim].set(
        b2.reshape(1, -1).astype(f32))
    w3_p = jnp.zeros((H, A), param_dtype).at[:hidden_dim, :action_dim].set(
        w3.astype(param_dtype))
    # Padded logits must not pick up softmax mass -> huge negative bias there.
    b3_p = jnp.full((1, A), _NEG_BIG, f32).at[:, :action_dim].set(
        b3.reshape(1, -1).astype(f32))

    return {"w1": w1_p, "b1": b1_p, "w2": w2_p, "b2": b2_p,
            "w3": w3_p, "b3": b3_p}


def _pick_batch_tile(B, batch_tile):
    batch_tile = max(8, _round_up(int(batch_tile), 8))
    if B > batch_tile:
        return batch_tile
    bt = B  # single block; block dim == full array dim is always legal
    if B >= 256:
        # Ensure >= 2 grid steps so v7x's two TensorCores both get work.
        half = _round_up((B + 1) // 2, 8)
        if half < B:
            bt = half
    return bt


# --------------------------------------------------------------------------
# Per-step forward: one pallas_call + output slice, nothing else.
# --------------------------------------------------------------------------
def actor_forward(obs, params, *, action_dim=None, batch_tile=256,
                  single_buffer_weights=None):
    """softmax(relu(relu(obs@W1+b1)@W2+b2)@W3+b3) with pre-padded params."""
    B, obs_dim = obs.shape
    w1_p, b1_p = params["w1"], params["b1"]
    w2_p, b2_p = params["w2"], params["b2"]
    w3_p, b3_p = params["w3"], params["b3"]
    assert w1_p.shape[0] == obs_dim, "params were prepared for another obs_dim"
    H = w1_p.shape[1]
    A = w3_p.shape[1]

    bt = _pick_batch_tile(B, batch_tile)
    grid = (pl.cdiv(B, bt),)

    weight_bytes = sum(int(p.size) * p.dtype.itemsize
                       for p in (w1_p, b1_p, w2_p, b2_p, w3_p, b3_p))
    if single_buffer_weights is None:
        # Only bother single-buffering weights when they are big enough for
        # double-buffering to threaten the VMEM budget (v7x: 64 MiB physical).
        single_buffer_weights = weight_bytes > (8 << 20)

    def wspec(shape):
        # Constant block index -> the weight never changes across grid steps;
        # single-buffer it for large configs instead of double-buffering.
        if single_buffer_weights:
            return pl.BlockSpec(shape, lambda i: (0, 0),
                                pipeline_mode=pl.Buffered(1))
        return pl.BlockSpec(shape, lambda i: (0, 0))

    # VMEM budget: weights (+double buffer unless single-buffered), pipelined
    # obs/out tiles, and rough activation slabs; keep the 32 MiB default floor.
    wbuf = weight_bytes * (1 if single_buffer_weights else 2)
    io_bytes = 2 * (bt * obs_dim * obs.dtype.itemsize + bt * A * 4)
    act_bytes = 2 * bt * H * 4 + bt * A * 4
    vmem_limit = int(1.5 * (wbuf + io_bytes + act_bytes)) + (2 << 20)
    vmem_limit = min(max(vmem_limit, 32 << 20), 128 << 20)

    flops = 2 * B * (obs_dim * H + H * H + H * A)
    cost = pl.CostEstimate(
        flops=flops,
        transcendentals=B * A + B,  # exp + reciprocal
        bytes_accessed=int(obs.size) * obs.dtype.itemsize
        + weight_bytes + B * A * 4,
    )

    out_padded = pl.pallas_call(
        _actor_kernel,
        out_shape=jax.ShapeDtypeStruct((B, A), jnp.float32),
        grid_spec=pl.GridSpec(
            grid=grid,
            in_specs=[
                pl.BlockSpec((bt, obs_dim), lambda i: (i, 0)),  # obs tile
                wspec((obs_dim, H)),                            # W1
                wspec((1, H)),                                  # b1
                wspec((H, H)),                                  # W2
                wspec((1, H)),                                  # b2
                wspec((H, A)),                                  # W3
                wspec((1, A)),                                  # b3
            ],
            out_specs=pl.BlockSpec((bt, A), lambda i: (i, 0)),
        ),
        compiler_params=pltpu.CompilerParams(
            dimension_semantics=("parallel",),   # megacore-shardable on v7x
            vmem_limit_bytes=vmem_limit,
        ),
        cost_estimate=cost,
    )(obs, w1_p, b1_p, w2_p, b2_p, w3_p, b3_p)

    if action_dim is None:
        return out_padded          # caller consumes padded probs directly
    return out_padded[:, :action_dim]


def reference_forward(obs, w1, b1, w2, b2, w3, b3):
    h1 = jnp.maximum(obs @ w1 + b1.reshape(1, -1), 0.0)
    h2 = jnp.maximum(h1 @ w2 + b2.reshape(1, -1), 0.0)
    return jax.nn.softmax(h2 @ w3 + b3.reshape(1, -1), axis=-1)


if __name__ == "__main__":
    # Small shapes consistent with Actor(obs_dim, action_dim, hidden_dim).
    B, obs_dim, hidden_dim, action_dim = 16, 32, 32, 8

    key = jax.random.PRNGKey(0)
    k_obs, k_w1, k_b1, k_w2, k_b2, k_w3, k_b3 = jax.random.split(key, 7)

    obs = jax.random.normal(k_obs, (B, obs_dim), dtype=jnp.float32)

    # Deterministic synthetic parameters (stored as [in, out] = PyTorch W.T).
    w1 = jax.random.normal(k_w1, (obs_dim, hidden_dim), dtype=jnp.float32) * 0.1
    b1 = jax.random.normal(k_b1, (hidden_dim,), dtype=jnp.float32) * 0.1
    w2 = jax.random.normal(k_w2, (hidden_dim, hidden_dim), dtype=jnp.float32) * 0.1
    b2 = jax.random.normal(k_b2, (hidden_dim,), dtype=jnp.float32) * 0.1
    w3 = jax.random.normal(k_w3, (hidden_dim, action_dim), dtype=jnp.float32) * 0.1
    b3 = jax.random.normal(k_b3, (action_dim,), dtype=jnp.float32) * 0.1

    ref = reference_forward(obs, w1, b1, w2, b2, w3, b3)

    run = jax.jit(actor_forward, static_argnames=("action_dim", "batch_tile",
                                                  "single_buffer_weights"))

    # ---- f32 weight storage: tight correctness check ------------------------
    params_f32 = prepare_actor_params(w1, b1, w2, b2, w3, b3,
                                      param_dtype=jnp.float32)
    out_f32 = jax.block_until_ready(run(obs, params_f32, action_dim=action_dim))
    assert out_f32.shape == (B, action_dim)
    assert bool(jnp.allclose(jnp.sum(out_f32, axis=-1), 1.0, atol=5e-3))
    assert bool(jnp.allclose(out_f32, ref, atol=5e-3, rtol=5e-3))

    # ---- bf16 weight storage (fast MXU path on v5e/v6e/v7x): loose check ----
    params_bf16 = prepare_actor_params(w1, b1, w2, b2, w3, b3,
                                       param_dtype=jnp.bfloat16)
    out_bf16 = jax.block_until_ready(run(obs, params_bf16,
                                         action_dim=action_dim))
    assert out_bf16.shape == (B, action_dim)
    assert bool(jnp.allclose(jnp.sum(out_bf16, axis=-1), 1.0, atol=1e-2))
    assert bool(jnp.allclose(out_bf16, ref, atol=3e-2, rtol=3e-2))

    print("KERNEL_OK")
</pallas_src>

<mosaic_0001>
module attributes {stable_mosaic.version = 11 : i64} {
  func.func @_actor_kernel(%arg0: i32, %arg1: memref<16x32xf32, #tpu.memory_space<vmem>>, %arg2: memref<32x128xf32, #tpu.memory_space<vmem>>, %arg3: memref<1x128xf32, #tpu.memory_space<vmem>>, %arg4: memref<128x128xf32, #tpu.memory_space<vmem>>, %arg5: memref<1x128xf32, #tpu.memory_space<vmem>>, %arg6: memref<128x128xf32, #tpu.memory_space<vmem>>, %arg7: memref<1x128xf32, #tpu.memory_space<vmem>>, %arg8: memref<16x128xf32, #tpu.memory_space<vmem>>) attributes {dimension_semantics = [#tpu.dimension_semantics<parallel>], iteration_bounds = array<i64: 1>, scalar_prefetch = 0 : i64, scratch_operands = 0 : i64, tpu.core_type = #tpu.core_type<tc>, window_params = [{transform_indices = @transform_0, window_bounds = array<i64: 16, 32>}, {pipeline_mode = #tpu.pipeline_mode<synchronous>, transform_indices = @transform_1, window_bounds = array<i64: 32, 128>}, {pipeline_mode = #tpu.pipeline_mode<synchronous>, transform_indices = @transform_2, window_bounds = array<i64: 1, 128>}, {pipeline_mode = #tpu.pipeline_mode<synchronous>, transform_indices = @transform_3, window_bounds = array<i64: 128, 128>}, {pipeline_mode = #tpu.pipeline_mode<synchronous>, transform_indices = @transform_4, window_bounds = array<i64: 1, 128>}, {pipeline_mode = #tpu.pipeline_mode<synchronous>, transform_indices = @transform_5, window_bounds = array<i64: 128, 128>}, {pipeline_mode = #tpu.pipeline_mode<synchronous>, transform_indices = @transform_6, window_bounds = array<i64: 1, 128>}, {transform_indices = @transform_7, window_bounds = array<i64: 16, 128>}]} {
    %c0 = arith.constant 0 : index
    %c0_0 = arith.constant 0 : index
    %0 = vector.load %arg1[%c0, %c0_0] : memref<16x32xf32, #tpu.memory_space<vmem>>, vector<16x32xf32>
    %c0_1 = arith.constant 0 : index
    %c0_2 = arith.constant 0 : index
    %1 = vector.load %arg2[%c0_1, %c0_2] : memref<32x128xf32, #tpu.memory_space<vmem>>, vector<32x128xf32>
    %cst = arith.constant dense<0.000000e+00> : vector<16x128xf32>
    %2 = tpu.matmul %0, %1, %cst {dimension_numbers = #tpu.dot_dimension_numbers<[1], [0], [0], [1], [0, 0, 1, 1], [], []>} : vector<16x32xf32>, vector<32x128xf32>, vector<16x128xf32> -> vector<16x128xf32>
    %c0_3 = arith.constant 0 : index
    %c0_4 = arith.constant 0 : index
    %3 = vector.load %arg3[%c0_3, %c0_4] : memref<1x128xf32, #tpu.memory_space<vmem>>, vector<1x128xf32>
    %4 = vector.broadcast %3 : vector<1x128xf32> to vector<16x128xf32>
    %5 = arith.addf %2, %4 : vector<16x128xf32>
    %cst_5 = arith.constant 0.000000e+00 : f32
    %6 = vector.broadcast %cst_5 : f32 to vector<16x128xf32>
    %7 = arith.maximumf %5, %6 : vector<16x128xf32>
    %c0_6 = arith.constant 0 : index
    %c0_7 = arith.constant 0 : index
    %8 = vector.load %arg4[%c0_6, %c0_7] : memref<128x128xf32, #tpu.memory_space<vmem>>, vector<128x128xf32>
    %cst_8 = arith.constant dense<0.000000e+00> : vector<16x128xf32>
    %9 = tpu.matmul %7, %8, %cst_8 {dimension_numbers = #tpu.dot_dimension_numbers<[1], [0], [0], [1], [0, 0, 1, 1], [], []>} : vector<16x128xf32>, vector<128x128xf32>, vector<16x128xf32> -> vector<16x128xf32>
    %c0_9 = arith.constant 0 : index
    %c0_10 = arith.constant 0 : index
    %10 = vector.load %arg5[%c0_9, %c0_10] : memref<1x128xf32, #tpu.memory_space<vmem>>, vector<1x128xf32>
    %11 = vector.broadcast %10 : vector<1x128xf32> to vector<16x128xf32>
    %12 = arith.addf %9, %11 : vector<16x128xf32>
    %cst_11 = arith.constant 0.000000e+00 : f32
    %13 = vector.broadcast %cst_11 : f32 to vector<16x128xf32>
    %14 = arith.maximumf %12, %13 : vector<16x128xf32>
    %c0_12 = arith.constant 0 : index
    %c0_13 = arith.constant 0 : index
    %15 = vector.load %arg6[%c0_12, %c0_13] : memref<128x128xf32, #tpu.memory_space<vmem>>, vector<128x128xf32>
    %cst_14 = arith.constant dense<0.000000e+00> : vector<16x128xf32>
    %16 = tpu.matmul %14, %15, %cst_14 {dimension_numbers = #tpu.dot_dimension_numbers<[1], [0], [0], [1], [0, 0, 1, 1], [], []>} : vector<16x128xf32>, vector<128x128xf32>, vector<16x128xf32> -> vector<16x128xf32>
    %c0_15 = arith.constant 0 : index
    %c0_16 = arith.constant 0 : index
    %17 = vector.load %arg7[%c0_15, %c0_16] : memref<1x128xf32, #tpu.memory_space<vmem>>, vector<1x128xf32>
    %18 = vector.broadcast %17 : vector<1x128xf32> to vector<16x128xf32>
    %19 = arith.addf %16, %18 : vector<16x128xf32>
    %cst_17 = arith.constant dense<0xFF800000> : vector<16xf32>
    %20 = vector.multi_reduction <maximumf>, %19, %cst_17 [1] : vector<16x128xf32> to vector<16xf32>
    %21 = vector.shape_cast %20 : vector<16xf32> to vector<16x1xf32>
    %22 = vector.broadcast %21 : vector<16x1xf32> to vector<16x128xf32>
    %23 = arith.subf %19, %22 : vector<16x128xf32>
    %24 = math.exp %23 : vector<16x128xf32>
    %cst_18 = arith.constant dense<0.000000e+00> : vector<16xf32>
    %25 = vector.multi_reduction <add>, %24, %cst_18 [1] : vector<16x128xf32> to vector<16xf32>
    %26 = vector.shape_cast %25 : vector<16xf32> to vector<16x1xf32>
    %27 = tpu.reciprocal %26 {approx = true} : vector<16x1xf32> -> vector<16x1xf32>
    %28 = vector.broadcast %27 : vector<16x1xf32> to vector<16x128xf32>
    %29 = arith.mulf %24, %28 : vector<16x128xf32>
    %c0_19 = arith.constant 0 : index
    %c0_20 = arith.constant 0 : index
    %30 = vector.load %arg8[%c0_19, %c0_20] : memref<16x128xf32, #tpu.memory_space<vmem>>, vector<16x128xf32>
    tpu.vector_store %arg8[%c0_19, %c0_20], %29 {strides = array<i32>} : memref<16x128xf32, #tpu.memory_space<vmem>>, vector<16x128xf32>,
    return
  }
  func.func @transform_0(%arg0: i32) -> (i32, i32) {
    %c0_i32 = arith.constant 0 : i32
    %c0_i32_0 = arith.constant 0 : i32
    return %arg0, %c0_i32 : i32, i32
  }
  func.func @transform_1(%arg0: i32) -> (i32, i32) {
    %c0_i32 = arith.constant 0 : i32
    %c0_i32_0 = arith.constant 0 : i32
    %c0_i32_1 = arith.constant 0 : i32
    return %c0_i32, %c0_i32_0 : i32, i32
  }
  func.func @transform_2(%arg0: i32) -> (i32, i32) {
    %c0_i32 = arith.constant 0 : i32
    %c0_i32_0 = arith.constant 0 : i32
    %c0_i32_1 = arith.constant 0 : i32
    return %c0_i32, %c0_i32_0 : i32, i32
  }
  func.func @transform_3(%arg0: i32) -> (i32, i32) {
    %c0_i32 = arith.constant 0 : i32
    %c0_i32_0 = arith.constant 0 : i32
    %c0_i32_1 = arith.constant 0 : i32
    return %c0_i32, %c0_i32_0 : i32, i32
  }
  func.func @transform_4(%arg0: i32) -> (i32, i32) {
    %c0_i32 = arith.constant 0 : i32
    %c0_i32_0 = arith.constant 0 : i32
    %c0_i32_1 = arith.constant 0 : i32
    return %c0_i32, %c0_i32_0 : i32, i32
  }
  func.func @transform_5(%arg0: i32) -> (i32, i32) {
    %c0_i32 = arith.constant 0 : i32
    %c0_i32_0 = arith.constant 0 : i32
    %c0_i32_1 = arith.constant 0 : i32
    return %c0_i32, %c0_i32_0 : i32, i32
  }
  func.func @transform_6(%arg0: i32) -> (i32, i32) {
    %c0_i32 = arith.constant 0 : i32
    %c0_i32_0 = arith.constant 0 : i32
    %c0_i32_1 = arith.constant 0 : i32
    return %c0_i32, %c0_i32_0 : i32, i32
  }
  func.func @transform_7(%arg0: i32) -> (i32, i32) {
    %c0_i32 = arith.constant 0 : i32
    %c0_i32_0 = arith.constant 0 : i32
    return %arg0, %c0_i32 : i32, i32
  }
}

</mosaic_0001>

<bundles_post_ra>
// kernel: actor_forward.1
= control target key start
LH: loop header
LB: loop body
LE: loop exit
PB: predicated region body
PF: predicated region fallthrough
CT: control target
= control target key end

     0   :  { %12 = vsyncpa [#allocation3], 0  ;;  %s497_s0 = inlined_call_operand.hbm [shape: f32[16,32], index: 0, kind: input, shape index: {}]   ;;  %s498_s1 = inlined_call_operand.hbm [shape: f32[32,128], index: 1, kind: input, shape index: {}]   ;;  %s499_s2 = inlined_call_operand.hbm [shape: f32[1,128], index: 2, kind: input, shape index: {}]   ;;  %s500_s3 = inlined_call_operand.hbm [shape: f32[128,128], index: 3, kind: input, shape index: {}]   ;;  %s501_s4 = inlined_call_operand.vmem [shape: f32[1,128], index: 4, kind: input, shape index: {}]   ;;  %s502_s5 = inlined_call_operand.hbm [shape: f32[128,128], index: 5, kind: input, shape index: {}]   ;;  %s503_s6 = inlined_call_operand.vmem [shape: f32[1,128], index: 6, kind: input, shape index: {}]   ;;  %s504_s7 = inlined_call_operand.vmem [shape: f32[16,128], index: 7, kind: output, shape index: {}]  }
   0x1   :  { %13 = vsyncpa [#allocation5], 0 }
   0x2   :  { %14 = vsyncpa [#allocation8], 0  ;;  %s32_s26 = sshll.u32 %s498_s1, 4  ;;  %s421_s27 = smov [#allocation4]   ;;  %s33_s26 = int_to_ptr.hbm [resolvable:$true] %s32_s26 }
   0x3   :  { %s34_s28 = sshll.u32 %s421_s27, 4  ;;  %s56_s8 = sshll.u32 %s500_s3, 4  ;;  %s35_s28 = int_to_ptr.vmem [resolvable:$true] %s34_s28  ;;  %s57_s8 = int_to_ptr.hbm [resolvable:$true] %s56_s8 }
   0x4   :  { %s422_s9 = smov 128   ;;  %s423_s10 = smov 8  }
   0x5   :  { %40 = dma.hbm_to_vmem [thread:$0]  %s33_s26, 512, %s35_s28, [#allocation5], %s422_s9, %s422_s9, %s423_s10  }
   0x6   :  { %s424_s11 = smov [#allocation7]   ;;  %s19_s15 = sshll.u32 %s497_s0, 4  ;;  %s20_s15 = int_to_ptr.hbm [resolvable:$true] %s19_s15 }
   0x7   :  { %s58_s12 = sshll.u32 %s424_s11, 4  ;;  %s46_s17 = sshll.u32 %s499_s2, 4  ;;  %s59_s12 = int_to_ptr.vmem [resolvable:$true] %s58_s12  ;;  %s47_s17 = int_to_ptr.hbm [resolvable:$true] %s46_s17 }
   0x8   :  { %64 = dma.hbm_to_vmem [thread:$0]  %s57_s8, 2048, %s59_s12, [#allocation8], %s422_s9, %s422_s9, %s423_s10  }
   0x9   :  { %s425_s18 = smov [#allocation2]   ;;  %s426_s3 = smov [#allocation6]  }
   0xa   :  { %s21_s19 = sshll.u32 %s425_s18, 4  ;;  %s48_s20 = sshll.u32 %s426_s3, 4  ;;  %s22_s19 = int_to_ptr.vmem [resolvable:$true] %s21_s19  ;;  %s49_s20 = int_to_ptr.vmem [resolvable:$true] %s48_s20 }
   0xb   :  { %27 = dma.hbm_to_vmem [thread:$0]  %s20_s15, 256, %s22_s19, [#allocation3], %s422_s9, %s422_s9, %s423_s10  }
   0xc   :  { %s71_s23 = sshll.u32 %s502_s5, 4  ;;  %s427_s0 = smov [#allocation9]   ;;  %s72_s23 = int_to_ptr.hbm [resolvable:$true] %s71_s23 }
   0xd   :  { %51 = dma.hbm_to_vmem [thread:$0]  %s47_s17, 16, %s49_s20, [#allocation5]  }
   0xe   :  { %s73_s24 = sshll.u32 %s427_s0, 4  ;;  %s74_s24 = int_to_ptr.vmem [resolvable:$true] %s73_s24 }
   0xf   :  { %79 = dma.hbm_to_vmem [thread:$0]  %s72_s23, 2048, %s74_s24, [#allocation8], %s422_s9, %s422_s9, %s423_s10  }
  0x10   :  { %415 = dma.done.wait [#allocation3], 256  }
  0x11   :  { %416 = vsyncadd [#allocation3], 4294967040 }
  0x12   :  { %417 = dma.done.wait [#allocation5], 528  }
  0x13   :  { %418 = vsyncadd [#allocation5], 4294966768 }
  0x14   :  { %419 = dma.done.wait [#allocation8], 4096  }
  0x15   :  { %420 = vsyncadd [#allocation8], 4294963200  ;;  %v107_v0 = vld [vmem:[#allocation4 + $0x18] sm:$0xff]  ;;  %v106_v1 = vld [vmem:[#allocation4 + $0x10] sm:$0xff]  ;;  %vm112_vm0 = vcmask 261120  }
  0x16   :  { %131 = vmatpush.msra.mxu0 %v107_v0  ;;  %v105_v2 = vld [vmem:[#allocation4 + $0x8] sm:$0xff]  ;;  %v159_v3 = vld [vmem:[#allocation7 + $0x78] sm:$0xff]  ;;  %v158_v4 = vld [vmem:[#allocation7 + $0x70] sm:$0xff] }
  0x17   :  { %164 = vmatpush.msra.mxu1 %v159_v3  ;;  %v104_v5 = vld [vmem:[#allocation4] sm:$0xff]  ;;  %v157_v6 = vld [vmem:[#allocation7 + $0x68] sm:$0xff]  ;;  %261 = vmatpush.msra.mxu3 %v159_v3  ;;  %v154_v10 = vld [vmem:[#allocation7 + $0x50] sm:$0xff] }
  0x18   :  { %132 = vmatpush.msra.mxu0 %v106_v1  ;;  %v102_v7 = vld [vmem:[#allocation2] sm:$0xff]  ;;  %v156_v8 = vld [vmem:[#allocation7 + $0x60] sm:$0xff]  ;;  %v155_v9 = vld [vmem:[#allocation7 + $0x58] sm:$0xff] }
  0x19   :  { %165 = vmatpush.msra.mxu1 %v158_v4  ;;  %262 = vmatpush.msra.mxu3 %v158_v4  ;;  %v153_v11 = vld [vmem:[#allocation7 + $0x48] sm:$0xff]  ;;  %v103_v12 = vld [vmem:[#allocation2 + $0x8] sm:$0xff]  ;;  %v152_v13 = vld [vmem:[#allocation7 + $0x40] sm:$0xff] }
  0x1a   :  { %133 = vmatpush.msra.mxu0 %v105_v2  ;;  %v151_v14 = vld [vmem:[#allocation7 + $0x38] sm:$0xff]  ;;  %v150_v15 = vld [vmem:[#allocation7 + $0x30] sm:$0xff]  ;;  %v149_v16 = vld [vmem:[#allocation7 + $0x28] sm:$0xff] }
  0x1b   :  { %166 = vmatpush.msra.mxu1 %v157_v6  ;;  %263 = vmatpush.msra.mxu3 %v157_v6  ;;  %v148_v17 = vld [vmem:[#allocation7 + $0x20] sm:$0xff]  ;;  %v147_v18 = vld [vmem:[#allocation7 + $0x18] sm:$0xff]  ;;  %v146_v19 = vld [vmem:[#allocation7 + $0x10] sm:$0xff] }
  0x1c   :  { %134 = vmatpush.msra.mxu0 %v104_v5  ;;  %v145_v20 = vld [vmem:[#allocation7 + $0x8] sm:$0xff]  ;;  %v144_v21 = vld [vmem:[#allocation7] sm:$0xff]  ;;  %v204_v22 = vld [vmem:[#allocation9 + $0x78] sm:$0xff] }
  0x1d   :  { %259 = vmatmul.msk.f32.vlgmr.msra.gmra.mxu0 %vm112_vm0, %v102_v7  ;;  %167 = vmatpush.msra.mxu1 %v156_v8  ;;  %v203_v23 = vld [vmem:[#allocation9 + $0x70] sm:$0xff]  ;;  %v202_v24 = vld [vmem:[#allocation9 + $0x68] sm:$0xff]  ;;  %v201_v25 = vld [vmem:[#allocation9 + $0x60] sm:$0xff] }
  0x1e   :  { %264 = vmatpush.msra.mxu3 %v156_v8  ;;  %209 = vmatpush.msra.mxu2 %v204_v22  ;;  %v200_v26 = vld [vmem:[#allocation9 + $0x58] sm:$0xff]  ;;  %v199_v27 = vld [vmem:[#allocation9 + $0x50] sm:$0xff]  ;;  %v198_v28 = vld [vmem:[#allocation9 + $0x48] sm:$0xff] }
  0x1f   :  { %168 = vmatpush.msra.mxu1 %v155_v9  ;;  %v197_v29 = vld [vmem:[#allocation9 + $0x40] sm:$0xff]  ;;  %v196_v30 = vld [vmem:[#allocation9 + $0x38] sm:$0xff]  ;;  %v195_v32 = vld [vmem:[#allocation9 + $0x30] sm:$0xff] }
  0x20   :  { %265 = vmatpush.msra.mxu3 %v155_v9  ;;  %210 = vmatpush.msra.mxu2 %v203_v23  ;;  %v284_v31 = vld [vmem:[#allocation6] ss:$0 sm:$0xff]  ;;  %v194_v33 = vld [vmem:[#allocation9 + $0x28] sm:$0xff]  ;;  %v193_v36 = vld [vmem:[#allocation9 + $0x20] sm:$0xff] }
  0x21   :  { %169 = vmatpush.msra.mxu1 %v154_v10  ;;  %v192_v38 = vld [vmem:[#allocation9 + $0x18] sm:$0xff]  ;;  %v191_v42 = vld [vmem:[#allocation9 + $0x10] sm:$0xff]  ;;  %v190_v43 = vld [vmem:[#allocation9 + $0x8] sm:$0xff] }
  0x22   :  { %266 = vmatpush.msra.mxu3 %v154_v10  ;;  %211 = vmatpush.msra.mxu2 %v202_v24  ;;  %v189_v44 = vld [vmem:[#allocation9] sm:$0xff]  ;;  %v285_v45 = vld [vmem:[%s501_s4] ss:$0 sm:$0xff] }
  0x23   :  { %170 = vmatpush.msra.mxu1 %v153_v11  ;;  %v286_v52 = vld [vmem:[%s503_s6] ss:$0 sm:$0xff] }
  0x24   :  { %267 = vmatpush.msra.mxu3 %v153_v11  ;;  %212 = vmatpush.msra.mxu2 %v201_v25 }
  0x25   :  { %260 = vmatmul.msk.f32.gmra.mxu0 %vm112_vm0, %v103_v12  ;;  %171 = vmatpush.msra.mxu1 %v152_v13 }
  0x26   :  { %268 = vmatpush.msra.mxu3 %v152_v13  ;;  %213 = vmatpush.msra.mxu2 %v200_v26 }
  0x27   :  { %172 = vmatpush.msra.mxu1 %v151_v14 }
  0x28   :  { %269 = vmatpush.msra.mxu3 %v151_v14  ;;  %214 = vmatpush.msra.mxu2 %v199_v27 }
  0x29   :  { %173 = vmatpush.msra.mxu1 %v150_v15 }
  0x2a   :  { %270 = vmatpush.msra.mxu3 %v150_v15  ;;  %215 = vmatpush.msra.mxu2 %v198_v28 }
  0x2b   :  { %174 = vmatpush.msra.mxu1 %v149_v16 }
  0x2c   :  { %271 = vmatpush.msra.mxu3 %v149_v16  ;;  %216 = vmatpush.msra.mxu2 %v197_v29 }
  0x2d   :  { %175 = vmatpush.msra.mxu1 %v148_v17 }
  0x2e   :  { %272 = vmatpush.msra.mxu3 %v148_v17  ;;  %217 = vmatpush.msra.mxu2 %v196_v30 }
  0x2f   :  { %176 = vmatpush.msra.mxu1 %v147_v18 }
  0x30   :  { %273 = vmatpush.msra.mxu3 %v147_v18  ;;  %218 = vmatpush.msra.mxu2 %v195_v32 }
  0x31   :  { %177 = vmatpush.msra.mxu1 %v146_v19 }
  0x32   :  { %274 = vmatpush.msra.mxu3 %v146_v19  ;;  %219 = vmatpush.msra.mxu2 %v194_v33 }
  0x33   :  { %178 = vmatpush.msra.mxu1 %v145_v20 }
  0x34   :  { %275 = vmatpush.msra.mxu3 %v145_v20  ;;  %220 = vmatpush.msra.mxu2 %v193_v36 }
  0x35   :  { %179 = vmatpush.msra.mxu1 %v144_v21 }
  0x36   :  { %276 = vmatpush.msra.mxu3 %v144_v21  ;;  %221 = vmatpush.msra.mxu2 %v192_v38 }
  0x38   :  { %222 = vmatpush.msra.mxu2 %v191_v42 }
  0x3a   :  { %223 = vmatpush.msra.mxu2 %v190_v43 }
  0x3c   :  { %224 = vmatpush.msra.mxu2 %v189_v44 }
  0x9a   :  { %v136_v34 = vpop.f32.mrf.mxu0 }
  0x9b   :  { %v137_v35 = vadd.f32 %v284_v31, %v136_v34 }
  0x9d   :  { %v142_v37 = vmax.f32 %v137_v35, 0.0 }
  0x9f   :  { %180 = vmatmul.f32.vlgmr.msra.gmra.mxu1 %v142_v37 }
  0xa2   :  { %v139_v39 = vpop.f32.mrf.mxu0 }
  0xa3   :  { %v140_v40 = vadd.f32 %v284_v31, %v139_v39 }
  0xa5   :  { %v143_v41 = vmax.f32 %v140_v40, 0.0 }
  0xa7   :  { %183 = vmatmul.f32.vlgmr.msra.gmra.mxu3 %v143_v41 }
 0x11c   :  { %v181_v46 = vpop.f32.mrf.mxu1 }
 0x11d   :  { %v182_v47 = vadd.f32 %v285_v45, %v181_v46 }
 0x11f   :  { %v187_v48 = vmax.f32 %v182_v47, 0.0 }
 0x121   :  { %225 = vmatmul.f32.vlgmr.msra.gmra.mxu2 %v187_v48 }
 0x12a   :  { %v184_v49 = vpop.f32.mrf.mxu3 }
 0x12b   :  { %v185_v50 = vadd.f32 %v285_v45, %v184_v49 }
 0x12d   :  { %v188_v51 = vmax.f32 %v185_v50, 0.0 }
 0x12f   :  { %228 = vmatmul.f32.gmra.mxu2 %v188_v51 }
 0x1a4   :  { %v226_v53 = vpop.f32.mrf.mxu2 }
 0x1a5   :  { %v227_v54 = vadd.f32 %v286_v52, %v226_v53 }
 0x1a7   :  { %232 = vmax.xlane.f32.xlu0 %v227_v54 }
 0x1b2   :  { %v229_v55 = vpop.f32.mrf.mxu2 }
 0x1b3   :  { %v230_v56 = vadd.f32 %v286_v52, %v229_v55 }
 0x1b5   :  { %234 = vmax.xlane.f32.xlu0 %v230_v56 }
 0x21a   :  { %v233_v57 = vpop.xlane.xlu0 %232 }
 0x21b   :  { %v236_v58 = vsub.f32 %v227_v54, %v233_v57 }
 0x21d   :  { %v238_v59 = vmul.f32 1.442695, %v236_v58 }
 0x21f   :  { %287 = vpow2.f32 %v238_v59 }
 0x225   :  { %v288_v60 = vpop.eup %287 }
 0x226   :  { %242 = vadd.xlane.f32.xlu1 %v288_v60 }
 0x228   :  { %v235_v61 = vpop.xlane.xlu0 %234 }
 0x229   :  { %v237_v62 = vsub.f32 %v230_v56, %v235_v61 }
 0x22b   :  { %v240_v63 = vmul.f32 1.442695, %v237_v62 }
 0x22d   :  { %289 = vpow2.f32 %v240_v63 }
 0x233   :  { %v290_v0 = vpop.eup %289 }
 0x234   :  { %244 = vadd.xlane.f32.xlu1 %v290_v0 }
 0x299   :  { %v243_v1 = vpop.xlane.xlu1 %242 }
 0x29a   :  { %291 = vrcp.f32 %v243_v1 }
 0x2a0   :  { %v292_v2 = vpop.eup %291 }
 0x2a1   :  { %v248_v3 = vmul.f32 %v292_v2, %v288_v60 }
 0x2a3   :  { %250 = vst [vmem:[%s504_s7] sm:$0xff] %v248_v3 }
 0x2a7   :  { %v245_v4 = vpop.xlane.xlu1 %244 }
 0x2a8   :  { %293 = vrcp.f32 %v245_v4 }
 0x2ae   :  { %v294_v5 = vpop.eup %293 }
 0x2af   :  { %v249_v6 = vmul.f32 %v294_v5, %v290_v0 }
 0x2b1   :  { %251 = vst [vmem:[%s504_s7 + $0x8] sm:$0xff] %v249_v6 }
 0x2b2   :  { %256 = vsyncpa [#allocation3], 1 }
 0x2b3   :  { %257 = vsyncpa [#allocation5], 1 }
 0x2b4   :  { %258 = vsyncpa [#allocation8], 1 }

</bundles_post_ra>
